<compile_context>
chip_gen: v7x
topology: tpu7x:2x2x1
jax: 0.10.0
libtpu: 0.0.40
codegen_flags: <defaults>
</compile_context>

<pallas_src>
import math

import jax
import jax.numpy as jnp
import numpy as np
from jax.experimental import pallas as pl
from jax.experimental.pallas import tpu as pltpu


def _round_up(x, m):
    return (x + m - 1) // m * m


def _patch_embed_kernel(p_ref, w_ref, b_ref, o_ref):
    """One (tm, tn) output tile = full-K matmul + bias.

    p_ref : (tm, K_pad)  bf16 im2col'd patch rows
    w_ref : (K_pad, tn)  bf16 projection weight (VMEM resident over M tiles)
    b_ref : (1,  tn)     f32 bias
    o_ref : (tm, tn)     output tile (written once, lane-dense)
    """
    acc = jnp.dot(p_ref[...], w_ref[...], preferred_element_type=jnp.float32)
    o_ref[...] = (acc + b_ref[...]).astype(o_ref.dtype)


def patch_embed(x, weight, bias, *, patch_size):
    """PatchEmbed forward.

    x      : (N, C, H, W)   NCHW input
    weight : (E, C, PH, PW) Conv2d weight (OIHW), kernel == stride == patch
    bias   : (E,)
    Returns (N, num_patches, E), matching proj -> flatten(2) -> transpose(1, 2).
    """
    N, C, H, W = x.shape
    E, C_w, PH, PW = weight.shape
    assert (PH, PW) == tuple(patch_size) and C_w == C
    assert H % PH == 0 and W % PW == 0
    Hn, Wn = H // PH, W // PW
    num_patches = Hn * Wn
    K = C * PH * PW
    M = N * num_patches

    # im2col: non-overlapping patches -> pure reshape/transpose (single pass).
    # Row order (n, i, j) matches conv-output flatten(2); column order
    # (c, ph, pw) matches weight.reshape(E, -1).
    # TODO(synk): fuse this transpose into the Pallas input DMA
    # (allow_input_fusion or an in-kernel (C,PH,PW)->K flatten) to drop one
    # full HBM round trip on the patch matrix.
    patches = x.reshape(N, C, Hn, PH, Wn, PW)
    patches = jnp.transpose(patches, (0, 2, 4, 1, 3, 5))   # (N, Hn, Wn, C, PH, PW)
    patches = patches.reshape(M, K)
    w_mat = weight.reshape(E, K).T                          # (K, E)
    b_mat = bias.reshape(1, E).astype(jnp.float32)

    out_dtype = x.dtype
    out_bytes = jnp.dtype(out_dtype).itemsize

    # --- tile selection -----------------------------------------------------
    K_pad = _round_up(K, 128)
    E_pad = _round_up(E, 128)

    # bf16 MXU operands -> 16-row sublane granularity on the M axis.
    tm = min(512, _round_up(M, 16))
    M_pad = _round_up(M, tm)

    # Largest multiple-of-128 divisor of E_pad whose working set fits a
    # conservative 24 MiB budget (portable across v5e/v6e/v7x once the scoped
    # limit is raised to 32 MiB).  For typical PatchEmbed (E <= ~1024) this is
    # the full E_pad, so the weight has a constant block index and is DMA'd
    # exactly once for the whole kernel.
    budget = 24 * 1024 * 1024

    def _vmem_need(tn):
        return (2 * tm * K_pad * 2            # double-buffered patch tiles (bf16)
                + 2 * K_pad * tn * 2          # weight buffers (bf16)
                + 2 * tm * tn * out_bytes     # double-buffered output tiles
                + 2 * tn * 4)                 # bias

    tn = E_pad
    while tn > 128 and (E_pad % tn != 0 or _vmem_need(tn) > budget):
        tn -= 128
    tn = max(tn, 128)

    # --- padding (no-op for typical PatchEmbed sizes) ------------------------
    if M_pad != M or K_pad != K:
        patches = jnp.pad(patches, ((0, M_pad - M), (0, K_pad - K)))
    if K_pad != K or E_pad != E:
        w_mat = jnp.pad(w_mat, ((0, K_pad - K), (0, E_pad - E)))
    if E_pad != E:
        b_mat = jnp.pad(b_mat, ((0, 0), (0, E_pad - E)))

    # Native bf16 MXU path, f32 accumulation inside the kernel.
    patches = patches.astype(jnp.bfloat16)
    w_mat = w_mat.astype(jnp.bfloat16)

    grid = (M_pad // tm, E_pad // tn)

    cost = pl.CostEstimate(
        flops=2 * M_pad * K_pad * E_pad,
        transcendentals=0,
        bytes_accessed=(M_pad * K_pad * 2 + K_pad * E_pad * 2
                        + E_pad * 4 + M_pad * E_pad * out_bytes))

    out = pl.pallas_call(
        _patch_embed_kernel,
        out_shape=jax.ShapeDtypeStruct((M_pad, E_pad), out_dtype),
        grid=grid,
        in_specs=[
            pl.BlockSpec((tm, K_pad), lambda i, j: (i, 0)),
            # Constant over the M axis -> weight stays resident in VMEM.
            pl.BlockSpec((K_pad, tn), lambda i, j: (0, j)),
            pl.BlockSpec((1, tn), lambda i, j: (0, j)),
        ],
        out_specs=pl.BlockSpec((tm, tn), lambda i, j: (i, j)),
        compiler_params=pltpu.CompilerParams(
            dimension_semantics=("parallel", "parallel"),
            vmem_limit_bytes=32 * 1024 * 1024),
        cost_estimate=cost,
    )(patches, w_mat, b_mat)

    return out[:M, :E].reshape(N, num_patches, E)


def _reference(x, weight, bias, patch_size):
    """Pure-JAX reference mirroring the PyTorch forward exactly (f32)."""
    y = jax.lax.conv_general_dilated(
        x, weight, window_strides=patch_size, padding="VALID",
        dimension_numbers=("NCHW", "OIHW", "NCHW"))
    y = y + bias[None, :, None, None]
    Nb, E, Hn, Wn = y.shape
    y = y.reshape(Nb, E, Hn * Wn)          # flatten(2)
    return jnp.transpose(y, (0, 2, 1))     # transpose(1, 2)


if __name__ == "__main__":
    key = jax.random.PRNGKey(0)
    kx, kw, kb = jax.random.split(key, 3)

    # Small shapes consistent with PatchEmbed defaults (in_chans=1, 16x16 patches).
    N, C, H, W = 2, 1, 128, 64
    patch = (16, 16)
    E = 256                                 # emb_dim (small test size)

    x = jax.random.normal(kx, (N, C, H, W), jnp.float32)

    # deterministic Conv2d-style init (uniform in +/- 1/sqrt(fan_in))
    fan_in = C * patch[0] * patch[1]
    bound = 1.0 / math.sqrt(fan_in)
    weight = jax.random.uniform(kw, (E, C, patch[0], patch[1]), jnp.float32,
                                -bound, bound)
    bias = jax.random.uniform(kb, (E,), jnp.float32, -bound, bound)

    out = patch_embed(x, weight, bias, patch_size=patch)
    out = jax.block_until_ready(out)

    ref = _reference(x, weight, bias, patch)
    # bf16 MXU operands with f32 accumulation -> loosened tolerance.
    np.testing.assert_allclose(np.asarray(out), np.asarray(ref),
                               rtol=2e-2, atol=2e-2)
    print("KERNEL_OK")
</pallas_src>

<mosaic_0001>
module attributes {stable_mosaic.version = 11 : i64} {
  func.func @_patch_embed_kernel(%arg0: i32, %arg1: i32, %arg2: memref<64x256xbf16, #tpu.memory_space<vmem>>, %arg3: memref<256x256xbf16, #tpu.memory_space<vmem>>, %arg4: memref<1x256xf32, #tpu.memory_space<vmem>>, %arg5: memref<64x256xf32, #tpu.memory_space<vmem>>) attributes {dimension_semantics = [#tpu.dimension_semantics<parallel>, #tpu.dimension_semantics<parallel>], iteration_bounds = array<i64: 1, 1>, scalar_prefetch = 0 : i64, scratch_operands = 0 : i64, tpu.core_type = #tpu.core_type<tc>, window_params = [{transform_indices = @transform_0, window_bounds = array<i64: 64, 256>}, {transform_indices = @transform_1, window_bounds = array<i64: 256, 256>}, {transform_indices = @transform_2, window_bounds = array<i64: 1, 256>}, {transform_indices = @transform_3, window_bounds = array<i64: 64, 256>}]} {
    %c0 = arith.constant 0 : index
    %c0_0 = arith.constant 0 : index
    %0 = vector.load %arg2[%c0, %c0_0] : memref<64x256xbf16, #tpu.memory_space<vmem>>, vector<64x256xbf16>
    %c0_1 = arith.constant 0 : index
    %c0_2 = arith.constant 0 : index
    %1 = vector.load %arg3[%c0_1, %c0_2] : memref<256x256xbf16, #tpu.memory_space<vmem>>, vector<256x256xbf16>
    %cst = arith.constant dense<0.000000e+00> : vector<64x256xf32>
    %2 = tpu.matmul %0, %1, %cst {dimension_numbers = #tpu.dot_dimension_numbers<[1], [0], [0], [1], [0, 0, 1, 1], [], []>} : vector<64x256xbf16>, vector<256x256xbf16>, vector<64x256xf32> -> vector<64x256xf32>
    %c0_3 = arith.constant 0 : index
    %c0_4 = arith.constant 0 : index
    %3 = vector.load %arg4[%c0_3, %c0_4] : memref<1x256xf32, #tpu.memory_space<vmem>>, vector<1x256xf32>
    %4 = vector.broadcast %3 : vector<1x256xf32> to vector<64x256xf32>
    %5 = arith.addf %2, %4 : vector<64x256xf32>
    %c0_5 = arith.constant 0 : index
    %c0_6 = arith.constant 0 : index
    %6 = vector.load %arg5[%c0_5, %c0_6] : memref<64x256xf32, #tpu.memory_space<vmem>>, vector<64x256xf32>
    tpu.vector_store %arg5[%c0_5, %c0_6], %5 {strides = array<i32>} : memref<64x256xf32, #tpu.memory_space<vmem>>, vector<64x256xf32>,
    return
  }
  func.func @transform_0(%arg0: i32, %arg1: i32) -> (i32, i32) {
    %c0_i32 = arith.constant 0 : i32
    %c0_i32_0 = arith.constant 0 : i32
    return %arg0, %c0_i32 : i32, i32
  }
  func.func @transform_1(%arg0: i32, %arg1: i32) -> (i32, i32) {
    %c0_i32 = arith.constant 0 : i32
    %c0_i32_0 = arith.constant 0 : i32
    return %c0_i32, %arg1 : i32, i32
  }
  func.func @transform_2(%arg0: i32, %arg1: i32) -> (i32, i32) {
    %c0_i32 = arith.constant 0 : i32
    %c0_i32_0 = arith.constant 0 : i32
    return %c0_i32, %arg1 : i32, i32
  }
  func.func @transform_3(%arg0: i32, %arg1: i32) -> (i32, i32) {
    %c0_i32 = arith.constant 0 : i32
    return %arg0, %arg1 : i32, i32
  }
}

</mosaic_0001>

<bundles_post_ra>
// kernel: tpu_custom_call.1
= control target key start
LH: loop header
LB: loop body
LE: loop exit
PB: predicated region body
PF: predicated region fallthrough
CT: control target
= control target key end

     0   :  { %8 = vsyncpa [#allocation3], 0  ;;  %s679_s0 = inlined_call_operand.hbm [shape: bf16[64,256], index: 0, kind: input, shape index: {}]   ;;  %s680_s1 = inlined_call_operand.hbm [shape: bf16[256,256], index: 1, kind: input, shape index: {}]   ;;  %s681_s2 = inlined_call_operand.vmem [shape: f32[1,256], index: 2, kind: input, shape index: {}]   ;;  %s682_s3 = inlined_call_operand.hbm [shape: f32[64,256], index: 3, kind: output, shape index: {}]  }
   0x1   :  { %9 = vsyncpa [#allocation6], 0 }
   0x2   :  { %10 = vsyncpa [#allocation4], 0  ;;  %s613_s12 = smov [#allocation2]   ;;  %s541_s16 = scalar_lea.hbm %s679_s0, 1024 }
   0x3   :  { %s16_s13 = sshll.u32 %s613_s12, 4  ;;  %p542_p0 = scmp.ne.s32.totalorder %s679_s0, %s541_s16  ;;  %s17_s13 = int_to_ptr.vmem [resolvable:$true] %s16_s13 }
   0x4   :  { %p545_p1 = scmp.lt.u32.totalorder %s541_s16, %s679_s0 }
   0x6   :  { %p547_p2 = pnand %p545_p1, %p542_p0 }
   0x8   :  { %550 = shalt.err (!%p547_p2)
}
   0x9   :  { %s551_s21 = scalar_lea.vmem %s17_s13, 1024  ;;  %p556_p4 = scmp.lt.s32.totalorder %s17_s13, %s17_s13 }
   0xa   :  { %p552_p3 = scmp.ne.s32.totalorder %s17_s13, %s551_s21  ;;  %p557_p5 = scmp.lt.s32.totalorder %s551_s21, %s551_s21 }
   0xc   :  { %p558_p6 = por %p557_p5, %p556_p4 }
   0xe   :  { %p559_p7 = pnand %p558_p6, %p552_p3 }
  0x10   :  { %562 = shalt.err (!%p559_p7)
}
  0x11   :  { %s614_s22 = smov 128   ;;  %s615_s23 = smov 8  }
  0x12   :  { %22 = dma.hbm_to_vmem [thread:$0]  %s679_s0, 1024, %s17_s13, [#allocation3], %s614_s22, %s614_s22, %s615_s23  }
  0x13   :  { %s616_s26 = smov [#allocation5]   ;;  %s563_s30 = scalar_lea.hbm %s680_s1, 4096 }
  0x14   :  { %s28_s27 = sshll.u32 %s616_s26, 4  ;;  %p564_p8 = scmp.ne.s32.totalorder %s680_s1, %s563_s30  ;;  %s29_s27 = int_to_ptr.vmem [resolvable:$true] %s28_s27 }
  0x15   :  { %p567_p9 = scmp.lt.u32.totalorder %s563_s30, %s680_s1 }
  0x17   :  { %p569_p10 = pnand %p567_p9, %p564_p8 }
  0x19   :  { %572 = shalt.err (!%p569_p10)
}
  0x1a   :  { %s573_s8 = scalar_lea.vmem %s29_s27, 4096  ;;  %p578_p12 = scmp.lt.s32.totalorder %s29_s27, %s29_s27 }
  0x1b   :  { %p574_p11 = scmp.ne.s32.totalorder %s29_s27, %s573_s8  ;;  %p579_p13 = scmp.lt.s32.totalorder %s573_s8, %s573_s8 }
  0x1d   :  { %p580_p0 = por %p579_p13, %p578_p12 }
  0x1f   :  { %p581_p1 = pnand %p580_p0, %p574_p11 }
  0x21   :  { %584 = shalt.err (!%p581_p1)
}
  0x22   :  { %34 = dma.hbm_to_vmem [thread:$0]  %s680_s1, 4096, %s29_s27, [#allocation6], %s614_s22, %s614_s22, %s615_s23  }
  0x23   :  { %607 = dma.done.wait [#allocation3], 1024  }
  0x24   :  { %608 = vsyncadd [#allocation3], 4294966272 }
  0x25   :  { %609 = dma.done.wait [#allocation6], 4096  }
  0x26   :  { %610 = vsyncadd [#allocation6], 4294963200  ;;  %v481_v0 = vld [vmem:[#allocation5 + $0x4] ss:$8 sps:$4 sm:$0xff]   ;;  %v483_v1 = vld [vmem:[#allocation5] ss:$8 sps:$4 sm:$0xff]   ;;  %v85_v40 = vlaneseq }
  0x27   :  { %295 = vmatprep.subr.bf16.mxu0 %v481_v0  ;;  %442 = vmatprep.subr.bf16.mxu1 %v481_v0  ;;  %v484_v2 = vld [vmem:[#allocation5 + $0x14] ss:$8 sps:$4 sm:$0xff]   ;;  %v486_v3 = vld [vmem:[#allocation5 + $0x10] ss:$8 sps:$4 sm:$0xff]   ;;  %v487_v4 = vld [vmem:[#allocation5 + $0x24] ss:$8 sps:$4 sm:$0xff]  }
  0x28   :  { %296 = vmatpush1.bf16.msra.mxu0 %v483_v1  ;;  %458 = vmatpush1.bf16.msra.mxu1 %v483_v1  ;;  %v489_v5 = vld [vmem:[#allocation5 + $0x20] ss:$8 sps:$4 sm:$0xff]   ;;  %v490_v6 = vld [vmem:[#allocation5 + $0x34] ss:$8 sps:$4 sm:$0xff]   ;;  %v492_v7 = vld [vmem:[#allocation5 + $0x30] ss:$8 sps:$4 sm:$0xff]  }
  0x29   :  { %297 = vmatprep.subr.bf16.mxu0 %v484_v2  ;;  %443 = vmatprep.subr.bf16.mxu1 %v484_v2  ;;  %v493_v8 = vld [vmem:[#allocation5 + $0x44] ss:$8 sps:$4 sm:$0xff]   ;;  %v495_v9 = vld [vmem:[#allocation5 + $0x40] ss:$8 sps:$4 sm:$0xff]   ;;  %v496_v10 = vld [vmem:[#allocation5 + $0x54] ss:$8 sps:$4 sm:$0xff]  }
  0x2a   :  { %v498_v11 = vld [vmem:[#allocation5 + $0x50] ss:$8 sps:$4 sm:$0xff]   ;;  %v499_v12 = vld [vmem:[#allocation5 + $0x64] ss:$8 sps:$4 sm:$0xff]   ;;  %v501_v14 = vld [vmem:[#allocation5 + $0x60] ss:$8 sps:$4 sm:$0xff]  }
  0x2b   :  { %v531_v13 = vld [vmem:[#allocation2 + $0x4] ss:$8 sps:$4 sm:$0xff]   ;;  %v502_v16 = vld [vmem:[#allocation5 + $0x74] ss:$8 sps:$4 sm:$0xff]   ;;  %v504_v17 = vld [vmem:[#allocation5 + $0x70] ss:$8 sps:$4 sm:$0xff]  }
  0x2c   :  { %298 = vmatpush1.bf16.msra.mxu0 %v486_v3  ;;  %459 = vmatpush1.bf16.msra.mxu1 %v486_v3  ;;  %v534_v15 = vld [vmem:[#allocation2 + $0x24] ss:$8 sps:$4 sm:$0xff]   ;;  %v507_v19 = vld [vmem:[#allocation5 + $0x80] ss:$8 sps:$4 sm:$0xff]   ;;  %v508_v20 = vld [vmem:[#allocation5 + $0x94] ss:$8 sps:$4 sm:$0xff]  }
  0x2d   :  { %299 = vmatprep.subr.bf16.mxu0 %v487_v4  ;;  %444 = vmatprep.subr.bf16.mxu1 %v487_v4  ;;  %v505_v18 = vld [vmem:[#allocation5 + $0x84] ss:$8 sps:$4 sm:$0xff]   ;;  %v510_v21 = vld [vmem:[#allocation5 + $0x90] ss:$8 sps:$4 sm:$0xff]   ;;  %v513_v23 = vld [vmem:[#allocation5 + $0xa0] ss:$8 sps:$4 sm:$0xff]  }
  0x2e   :  { %327 = vmatprep.mubr.bf16.mxu0 %v531_v13  ;;  %347 = vmatprep.mubr.bf16.mxu1 %v534_v15  ;;  %v511_v22 = vld [vmem:[#allocation5 + $0xa4] ss:$8 sps:$4 sm:$0xff]   ;;  %v514_v24 = vld [vmem:[#allocation5 + $0xb4] ss:$8 sps:$4 sm:$0xff]   ;;  %v516_v25 = vld [vmem:[#allocation5 + $0xb0] ss:$8 sps:$4 sm:$0xff]  }
  0x2f   :  { %v517_v26 = vld [vmem:[#allocation5 + $0xc4] ss:$8 sps:$4 sm:$0xff]   ;;  %v519_v27 = vld [vmem:[#allocation5 + $0xc0] ss:$8 sps:$4 sm:$0xff]   ;;  %v520_v28 = vld [vmem:[#allocation5 + $0xd4] ss:$8 sps:$4 sm:$0xff]  }
  0x30   :  { %300 = vmatpush1.bf16.msra.mxu0 %v489_v5  ;;  %460 = vmatpush1.bf16.msra.mxu1 %v489_v5  ;;  %v522_v29 = vld [vmem:[#allocation5 + $0xd0] ss:$8 sps:$4 sm:$0xff]   ;;  %v523_v30 = vld [vmem:[#allocation5 + $0xe4] ss:$8 sps:$4 sm:$0xff]   ;;  %v525_v31 = vld [vmem:[#allocation5 + $0xe0] ss:$8 sps:$4 sm:$0xff]  }
  0x31   :  { %301 = vmatprep.subr.bf16.mxu0 %v490_v6  ;;  %445 = vmatprep.subr.bf16.mxu1 %v490_v6  ;;  %v526_v32 = vld [vmem:[#allocation5 + $0xf4] ss:$8 sps:$4 sm:$0xff]   ;;  %v528_v33 = vld [vmem:[#allocation5 + $0xf0] ss:$8 sps:$4 sm:$0xff]   ;;  %v529_v34 = vld [vmem:[#allocation2] ss:$8 sps:$4 sm:$0xff]  }
  0x32   :  { %v532_v35 = vld [vmem:[#allocation2 + $0x20] ss:$8 sps:$4 sm:$0xff]   ;;  %v535_v36 = vld [vmem:[#allocation2 + $0x14] ss:$8 sps:$4 sm:$0xff]   ;;  %v539_v38 = vld [vmem:[#allocation2 + $0x10] ss:$8 sps:$4 sm:$0xff]  }
  0x33   :  { %v537_v37 = vld [vmem:[#allocation2 + $0x34] ss:$8 sps:$4 sm:$0xff]   ;;  %v540_v39 = vld [vmem:[#allocation2 + $0x30] ss:$8 sps:$4 sm:$0xff]   ;;  %v86_v41 = vshrl.u32 %v85_v40, 7 }
  0x34   :  { %302 = vmatpush1.bf16.msra.mxu0 %v492_v7  ;;  %461 = vmatpush1.bf16.msra.mxu1 %v492_v7  ;;  %v83_v43 = vld [vmem:[%s681_s2] sm:$0x3]  ;;  %s617_s2 = smov [#allocation7]  }
  0x35   :  { %303 = vmatprep.subr.bf16.mxu0 %v493_v8  ;;  %446 = vmatprep.subr.bf16.mxu1 %v493_v8  ;;  %v87_v42 = vsub.s32 0, %v86_v41  ;;  %v91_v44 = vsub.s32 1, %v86_v41  ;;  %s389_s11 = sshll.u32 %s617_s2, 4  ;;  %s390_s11 = int_to_ptr.vmem [resolvable:$true] %s389_s11 }
  0x36   :  { %s585_s12 = scalar_lea.vmem %s390_s11, 2048  ;;  %p590_p3 = scmp.lt.s32.totalorder %s390_s11, %s390_s11 }
  0x37   :  { %v88_v45 = vrot.slane %v83_v43, %v87_v42  ;;  %v92_v46 = vrot.slane %v83_v43, %v91_v44  ;;  %p586_p2 = scmp.ne.s32.totalorder %s390_s11, %s585_s12  ;;  %p591_p4 = scmp.lt.s32.totalorder %s585_s12, %s585_s12 }
  0x38   :  { %304 = vmatpush1.bf16.msra.mxu0 %v495_v9  ;;  %462 = vmatpush1.bf16.msra.mxu1 %v495_v9 }
  0x39   :  { %305 = vmatprep.subr.bf16.mxu0 %v496_v10  ;;  %447 = vmatprep.subr.bf16.mxu1 %v496_v10  ;;  %p592_p5 = por %p591_p4, %p590_p3 }
  0x3b   :  { %p593_p6 = pnand %p592_p5, %p586_p2 }
  0x3c   :  { %306 = vmatpush1.bf16.msra.mxu0 %v498_v11  ;;  %463 = vmatpush1.bf16.msra.mxu1 %v498_v11 }
  0x3d   :  { %307 = vmatprep.subr.bf16.mxu0 %v499_v12  ;;  %448 = vmatprep.subr.bf16.mxu1 %v499_v12 }
  0x40   :  { %308 = vmatpush1.bf16.msra.mxu0 %v501_v14  ;;  %464 = vmatpush1.bf16.msra.mxu1 %v501_v14 }
  0x41   :  { %309 = vmatprep.subr.bf16.mxu0 %v502_v16  ;;  %449 = vmatprep.subr.bf16.mxu1 %v502_v16 }
  0x44   :  { %310 = vmatpush1.bf16.msra.mxu0 %v504_v17  ;;  %465 = vmatpush1.bf16.msra.mxu1 %v504_v17 }
  0x45   :  { %311 = vmatprep.subr.bf16.mxu0 %v505_v18  ;;  %450 = vmatprep.subr.bf16.mxu1 %v505_v18 }
  0x48   :  { %312 = vmatpush1.bf16.msra.mxu0 %v507_v19  ;;  %466 = vmatpush1.bf16.msra.mxu1 %v507_v19 }
  0x49   :  { %313 = vmatprep.subr.bf16.mxu0 %v508_v20  ;;  %451 = vmatprep.subr.bf16.mxu1 %v508_v20 }
  0x4c   :  { %314 = vmatpush1.bf16.msra.mxu0 %v510_v21  ;;  %467 = vmatpush1.bf16.msra.mxu1 %v510_v21 }
  0x4d   :  { %315 = vmatprep.subr.bf16.mxu0 %v511_v22  ;;  %452 = vmatprep.subr.bf16.mxu1 %v511_v22 }
  0x50   :  { %316 = vmatpush1.bf16.msra.mxu0 %v513_v23  ;;  %468 = vmatpush1.bf16.msra.mxu1 %v513_v23 }
  0x51   :  { %317 = vmatprep.subr.bf16.mxu0 %v514_v24  ;;  %453 = vmatprep.subr.bf16.mxu1 %v514_v24 }
  0x54   :  { %318 = vmatpush1.bf16.msra.mxu0 %v516_v25  ;;  %469 = vmatpush1.bf16.msra.mxu1 %v516_v25 }
  0x55   :  { %319 = vmatprep.subr.bf16.mxu0 %v517_v26  ;;  %454 = vmatprep.subr.bf16.mxu1 %v517_v26 }
  0x58   :  { %320 = vmatpush1.bf16.msra.mxu0 %v519_v27  ;;  %470 = vmatpush1.bf16.msra.mxu1 %v519_v27 }
  0x59   :  { %321 = vmatprep.subr.bf16.mxu0 %v520_v28  ;;  %455 = vmatprep.subr.bf16.mxu1 %v520_v28 }
  0x5c   :  { %322 = vmatpush1.bf16.msra.mxu0 %v522_v29  ;;  %471 = vmatpush1.bf16.msra.mxu1 %v522_v29 }
  0x5d   :  { %323 = vmatprep.subr.bf16.mxu0 %v523_v30  ;;  %456 = vmatprep.subr.bf16.mxu1 %v523_v30 }
  0x60   :  { %324 = vmatpush1.bf16.msra.mxu0 %v525_v31  ;;  %472 = vmatpush1.bf16.msra.mxu1 %v525_v31 }
  0x61   :  { %325 = vmatprep.subr.bf16.mxu0 %v526_v32  ;;  %457 = vmatprep.subr.bf16.mxu1 %v526_v32 }
  0x64   :  { %326 = vmatpush1.bf16.msra.mxu0 %v528_v33  ;;  %473 = vmatpush1.bf16.msra.mxu1 %v528_v33 }
  0x67   :  { %328 = vmatmul.mubr.bf16.vlgmr.msra.gmra.mrb[0].mxu0 %v529_v34  ;;  %348 = vmatmul.mubr.bf16.vlgmr.msra.gmra.mrb[0].mxu1 %v532_v35 }
  0x68   :  { %337 = vmatprep.mubr.bf16.mxu0 %v535_v36  ;;  %357 = vmatprep.mubr.bf16.mxu1 %v537_v37 }
  0x6f   :  { %338 = vmatmul.mubr.bf16.gmra.mrb[4].mxu0 %v539_v38  ;;  %358 = vmatmul.mubr.bf16.gmra.mrb[4].mxu1 %v540_v39 }
 0x13a   :  { %v329_v47 = vpop.f32.mrb[0].mxu0  ;;  %v349_v48 = vpop.f32.mrb[0].mxu1 }
 0x13b   :  { %v330_v49 = vadd.f32 %v329_v47, %v88_v45  ;;  %v350_v50 = vadd.f32 %v349_v48, %v88_v45  ;;  %v331_v51 = vpop.f32.mrb[1].mxu0  ;;  %v351_v52 = vpop.f32.mrb[1].mxu1 }
 0x13c   :  { %v332_v53 = vadd.f32 %v331_v51, %v92_v46  ;;  %v352_v54 = vadd.f32 %v351_v52, %v92_v46  ;;  %v333_v55 = vpop.f32.mrb[2].mxu0  ;;  %v353_v56 = vpop.f32.mrb[2].mxu1 }
 0x13d   :  { %368 = vst [vmem:[#allocation7] sm:$0xff] %v330_v49  ;;  %376 = vst [vmem:[#allocation7 + $0x40] sm:$0xff] %v350_v50  ;;  %v334_v57 = vadd.f32 %v333_v55, %v88_v45  ;;  %v354_v58 = vadd.f32 %v353_v56, %v88_v45  ;;  %v335_v59 = vpop.f32.mrb[3].mxu0  ;;  %v355_v60 = vpop.f32.mrb[3].mxu1 }
 0x13e   :  { %369 = vst [vmem:[#allocation7 + $0x8] sm:$0xff] %v332_v53  ;;  %377 = vst [vmem:[#allocation7 + $0x48] sm:$0xff] %v352_v54  ;;  %v336_v61 = vadd.f32 %v335_v59, %v92_v46  ;;  %v356_v62 = vadd.f32 %v355_v60, %v92_v46 }
 0x13f   :  { %370 = vst [vmem:[#allocation7 + $0x10] sm:$0xff] %v334_v57  ;;  %378 = vst [vmem:[#allocation7 + $0x50] sm:$0xff] %v354_v58 }
 0x140   :  { %371 = vst [vmem:[#allocation7 + $0x18] sm:$0xff] %v336_v61  ;;  %379 = vst [vmem:[#allocation7 + $0x58] sm:$0xff] %v356_v62 }
 0x142   :  { %v339_v63 = vpop.f32.mrb[4].mxu0  ;;  %v359_v0 = vpop.f32.mrb[4].mxu1 }
 0x143   :  { %v340_v1 = vadd.f32 %v339_v63, %v88_v45  ;;  %v360_v2 = vadd.f32 %v359_v0, %v88_v45  ;;  %v341_v3 = vpop.f32.mrb[5].mxu0  ;;  %v361_v4 = vpop.f32.mrb[5].mxu1 }
 0x144   :  { %v342_v5 = vadd.f32 %v341_v3, %v92_v46  ;;  %v362_v6 = vadd.f32 %v361_v4, %v92_v46  ;;  %v343_v7 = vpop.f32.mrb[6].mxu0  ;;  %v363_v8 = vpop.f32.mrb[6].mxu1 }
 0x145   :  { %372 = vst [vmem:[#allocation7 + $0x20] sm:$0xff] %v340_v1  ;;  %380 = vst [vmem:[#allocation7 + $0x60] sm:$0xff] %v360_v2  ;;  %v344_v9 = vadd.f32 %v343_v7, %v88_v45  ;;  %v364_v10 = vadd.f32 %v363_v8, %v88_v45  ;;  %v345_v11 = vpop.f32.mrb[7].mxu0  ;;  %v365_v12 = vpop.f32.mrb[7].mxu1 }
 0x146   :  { %373 = vst [vmem:[#allocation7 + $0x28] sm:$0xff] %v342_v5  ;;  %381 = vst [vmem:[#allocation7 + $0x68] sm:$0xff] %v362_v6  ;;  %v346_v13 = vadd.f32 %v345_v11, %v92_v46  ;;  %v366_v14 = vadd.f32 %v365_v12, %v92_v46 }
 0x147   :  { %374 = vst [vmem:[#allocation7 + $0x30] sm:$0xff] %v344_v9  ;;  %382 = vst [vmem:[#allocation7 + $0x70] sm:$0xff] %v364_v10 }
 0x148   :  { %375 = vst [vmem:[#allocation7 + $0x38] sm:$0xff] %v346_v13  ;;  %383 = vst [vmem:[#allocation7 + $0x78] sm:$0xff] %v366_v14 }
 0x149   :  { %596 = shalt.err (!%p593_p6)
}
 0x14a   :  { %s597_s15 = scalar_lea.hbm %s682_s3, 2048 }
 0x14b   :  { %p598_p7 = scmp.ne.s32.totalorder %s682_s3, %s597_s15  ;;  %p601_p8 = scmp.lt.u32.totalorder %s597_s15, %s682_s3 }
 0x14d   :  { %p603_p9 = pnand %p601_p8, %p598_p7 }
 0x14f   :  { %606 = shalt.err (!%p603_p9)
}
 0x150   :  { %s618_s20 = smov 256   ;;  %s619_s21 = smov 16  }
 0x151   :  { %395 = dma.vmem_to_hbm [thread:$0]  %s390_s11, 2048, %s682_s3, [#allocation4], %s618_s20, %s618_s20, %s619_s21  }
 0x152   :  { %611 = dma.done.wait [#allocation4], 2048  }
 0x153   :  { %612 = vsyncadd [#allocation4], 4294965248 }
 0x154   :  { %399 = vsyncpa [#allocation3], 1 }
 0x155   :  { %400 = vsyncpa [#allocation6], 1 }
 0x156   :  { %401 = vsyncpa [#allocation4], 1 }

</bundles_post_ra>
